<compile_context>
chip_gen: v5e
topology: v5e:2x2
jax: 0.10.0
libtpu: 0.0.40
codegen_flags: <defaults>
</compile_context>

<pallas_src>
import functools

import jax
import jax.numpy as jnp
from jax.experimental import pallas as pl
from jax.experimental.pallas import tpu as pltpu


def _round_up(x, m):
    return (x + m - 1) // m * m


# ----------------------------- fused Pallas kernel -----------------------------

def _conv_subsample_kernel(r0_ref, r1_ref, r2_ref, r2s_ref, r3s_ref,
                           w1_ref, b1_ref, w2_ref, b2_ref, g_ref, bt_ref,
                           o_ref, *, t1, tt, cout, eps, compute_dtype):
    """One (batch, time-tile) step of conv1+ReLU -> conv2+ReLU -> LayerNorm.

    r*_ref : (1, N4, Cin_p)   phase-deinterleaved, zero-padded input views
    w1_ref : (3, Cin_p, Cout_p)    w2_ref : (3, Cout_p, Cout_p)
    b1/b2/gamma/beta : (1, Cout_p)
    o_ref  : (1, TT, Cout_p)
    """
    t = pl.program_id(1)
    j0 = pl.multiple_of(t * tt, 8)          # first final-output row of this tile

    def tap(w_ref, k):
        w = w_ref[k]
        return w.astype(compute_dtype) if compute_dtype != jnp.float32 else w

    def rows(ref, start, size):
        v = ref[0, pl.ds(start, size), :]
        return v.astype(compute_dtype) if compute_dtype != jnp.float32 else v

    b1 = b1_ref[...]
    b2 = b2_ref[...]

    # ---- conv1 + ReLU, even conv1 rows: h1[2j], j in [j0, j0+tt) -------------
    # h1[2j] uses x_pad[4j + k]  ->  R0[j], R1[j], R2[j]
    h1_even = jnp.dot(rows(r0_ref, j0, tt), tap(w1_ref, 0),
                      preferred_element_type=jnp.float32)
    h1_even += jnp.dot(rows(r1_ref, j0, tt), tap(w1_ref, 1),
                       preferred_element_type=jnp.float32)
    h1_even += jnp.dot(rows(r2_ref, j0, tt), tap(w1_ref, 2),
                       preferred_element_type=jnp.float32)
    h1_even = jnp.maximum(h1_even + b1, 0.0)

    # ---- conv1 + ReLU, odd conv1 rows (+1 halo row): h1[2j-1], j in [j0, j0+tt]
    # h1[2j-1] uses x_pad[4j-2+k]  ->  R2s[j], R3s[j], R0[j]
    h1_odd = jnp.dot(rows(r2s_ref, j0, tt + 1), tap(w1_ref, 0),
                     preferred_element_type=jnp.float32)
    h1_odd += jnp.dot(rows(r3s_ref, j0, tt + 1), tap(w1_ref, 1),
                      preferred_element_type=jnp.float32)
    h1_odd += jnp.dot(rows(r0_ref, j0, tt + 1), tap(w1_ref, 2),
                      preferred_element_type=jnp.float32)
    h1_odd = jnp.maximum(h1_odd + b1, 0.0)
    # Rows that correspond to conv2's zero padding (h1 row index 2j-1 outside [0, T1)).
    row = j0 + jax.lax.broadcasted_iota(jnp.int32, (tt + 1, 1), 0)
    io = 2 * row - 1
    h1_odd = jnp.where((io >= 0) & (io < t1), h1_odd, 0.0)

    # ---- conv2 + ReLU --------------------------------------------------------
    a = h1_odd[0:tt]          # h1_pad[2j]
    b = h1_even               # h1_pad[2j+1]
    c = h1_odd[1:tt + 1]      # h1_pad[2j+2]
    if compute_dtype != jnp.float32:
        a = a.astype(compute_dtype)
        b = b.astype(compute_dtype)
        c = c.astype(compute_dtype)
    h2 = jnp.dot(a, tap(w2_ref, 0), preferred_element_type=jnp.float32)
    h2 += jnp.dot(b, tap(w2_ref, 1), preferred_element_type=jnp.float32)
    h2 += jnp.dot(c, tap(w2_ref, 2), preferred_element_type=jnp.float32)
    h2 = jnp.maximum(h2 + b2, 0.0)                       # (TT, Cout_p), f32

    # ---- LayerNorm over the first `cout` channels (padding lanes are exactly 0)
    cp = h2.shape[-1]
    lane = jax.lax.broadcasted_iota(jnp.int32, (1, cp), 1)
    lane_mask = lane < cout
    inv_n = 1.0 / float(cout)
    mean = jnp.sum(h2, axis=-1, keepdims=True) * inv_n
    xc = h2 - mean                                        # reused for var and output
    var = jnp.sum(jnp.where(lane_mask, xc * xc, 0.0), axis=-1, keepdims=True) * inv_n
    y = xc * jax.lax.rsqrt(var + eps)
    o_ref[0] = (y * g_ref[...] + bt_ref[...]).astype(o_ref.dtype)


# ----------------------------- parameter preparation (hoisted) -----------------------------

def prepare_params(torch_params):
    """PyTorch layout -> kernel layout, done ONCE outside the jitted forward.

    torch layout: w1 (Cout, Cin, 3), w2 (Cout, Cout, 3), b1/b2/gamma/beta (Cout,).
    kernel layout: per-tap weights (3, Cin_p, Cout_p) / (3, Cout_p, Cout_p), channel axes
    zero padded to a multiple of 128; vectors as (1, Cout_p).
    """
    w1, w2 = torch_params["w1"], torch_params["w2"]
    cout, cin = int(w1.shape[0]), int(w1.shape[1])
    cin_p = _round_up(cin, 128)
    cout_p = _round_up(cout, 128)

    def conv_w(w, rows_p):                      # (Cout, Cin_k, 3) -> (3, rows_p, Cout_p)
        wt = jnp.transpose(w, (2, 1, 0))        # (3, Cin_k, Cout): W[k, ci, co] = w[co, ci, k]
        return jnp.pad(wt, ((0, 0), (0, rows_p - wt.shape[1]), (0, cout_p - cout)))

    def vec(v):
        return jnp.pad(v, (0, cout_p - cout)).reshape(1, cout_p)

    return {
        "w1": conv_w(w1, cin_p),
        "b1": vec(torch_params["b1"]),
        "w2": conv_w(w2, cout_p),
        "b2": vec(torch_params["b2"]),
        "gamma": vec(torch_params["gamma"]),
        "beta": vec(torch_params["beta"]),
    }


# ----------------------------- forward (one pallas_call) -----------------------------

def conv_subsampling_forward(x, prep, *, output_dim, time_tile=256, eps=1e-5,
                             compute_dtype=jnp.float32):
    """x: (B, T, input_dim) -> (B, T_out2, output_dim). Matches the torch module."""
    B, T, cin = x.shape
    cin_p = prep["w1"].shape[1]
    cout_p = prep["w2"].shape[1]
    t1 = (T - 1) // 2 + 1                    # conv1 output length (k=3, s=2, p=1)
    t2 = (t1 - 1) // 2 + 1                   # conv2 output length

    tt = _round_up(min(time_tile, _round_up(t2, 8)), 8)    # output-time tile (mult. of 8)
    t2_pad = _round_up(t2, tt)
    n_t = t2_pad // tt
    n4 = _round_up(t2_pad + 1, 8)            # rows per phase view (resident per batch elem)
    # TODO(synk): for extremely long sequences, tile the phase views along time with halos
    # instead of keeping the full per-batch views resident in VMEM.

    # Phase-deinterleaved views of the zero-padded input x_pad[p] = x[p-1]:
    #   R0[n]=x_pad[4n]  R1[n]=x_pad[4n+1]  R2[n]=x_pad[4n+2]  R2s[n]=x_pad[4n-2]  R3s[n]=x_pad[4n-1]
    total = 4 * n4 + 4
    xp = jnp.pad(x, ((0, 0), (1, total - T - 1), (0, cin_p - cin)))
    xps = jnp.pad(x, ((0, 0), (3, total - T - 3), (0, cin_p - cin)))
    r0 = xp[:, 0:4 * n4:4, :]
    r1 = xp[:, 1:4 * n4 + 1:4, :]
    r2 = xp[:, 2:4 * n4 + 2:4, :]
    r2s = xps[:, 0:4 * n4:4, :]
    r3s = xps[:, 1:4 * n4 + 1:4, :]

    phase_spec = pl.BlockSpec((1, n4, cin_p), lambda b, t: (b, 0, 0))
    w1_spec = pl.BlockSpec((3, cin_p, cout_p), lambda b, t: (0, 0, 0))
    w2_spec = pl.BlockSpec((3, cout_p, cout_p), lambda b, t: (0, 0, 0))
    vec_spec = pl.BlockSpec((1, cout_p), lambda b, t: (0, 0))

    flops = 2 * B * n_t * ((2 * tt + 1) * 3 * cin_p * cout_p + tt * 3 * cout_p * cout_p)
    bytes_accessed = 4 * (5 * B * n4 * cin_p + B * t2_pad * cout_p
                          + 3 * cin_p * cout_p + 3 * cout_p * cout_p + 4 * cout_p)

    kernel = functools.partial(
        _conv_subsample_kernel, t1=t1, tt=tt, cout=int(output_dim), eps=eps,
        compute_dtype=compute_dtype)

    out = pl.pallas_call(
        kernel,
        out_shape=jax.ShapeDtypeStruct((B, t2_pad, cout_p), x.dtype),
        grid=(B, n_t),
        in_specs=[phase_spec, phase_spec, phase_spec, phase_spec, phase_spec,
                  w1_spec, vec_spec, w2_spec, vec_spec, vec_spec, vec_spec],
        out_specs=pl.BlockSpec((1, tt, cout_p), lambda b, t: (b, t, 0)),
        compiler_params=pltpu.CompilerParams(
            dimension_semantics=("parallel", "parallel"),
            vmem_limit_bytes=32 * 1024 * 1024),
        cost_estimate=pl.CostEstimate(flops=flops, transcendentals=B * t2_pad,
                                      bytes_accessed=bytes_accessed),
    )(r0, r1, r2, r2s, r3s,
      prep["w1"], prep["b1"], prep["w2"], prep["b2"], prep["gamma"], prep["beta"])

    return out[:, :t2, :output_dim]


# ----------------------------- reference (pure JAX, for checking) -----------------------------

def reference_forward(x, params, eps=1e-5):
    xc = jnp.transpose(x, (0, 2, 1))  # (B, Cin, T)
    h = jax.lax.conv_general_dilated(
        xc, params["w1"], window_strides=(2,), padding=((1, 1),),
        dimension_numbers=("NCH", "OIH", "NCH"))
    h = jnp.maximum(h + params["b1"][None, :, None], 0.0)
    h = jax.lax.conv_general_dilated(
        h, params["w2"], window_strides=(2,), padding=((1, 1),),
        dimension_numbers=("NCH", "OIH", "NCH"))
    h = jnp.maximum(h + params["b2"][None, :, None], 0.0)
    h = jnp.transpose(h, (0, 2, 1))  # (B, T_out, Cout)
    mean = h.mean(-1, keepdims=True)
    var = ((h - mean) ** 2).mean(-1, keepdims=True)
    return (h - mean) / jnp.sqrt(var + eps) * params["gamma"] + params["beta"]


# ----------------------------- main -----------------------------

if __name__ == "__main__":
    B, T, INPUT_DIM, OUTPUT_DIM = 2, 16, 8, 16

    key = jax.random.PRNGKey(0)
    k_x, k_w1, k_b1, k_w2, k_b2 = jax.random.split(key, 5)

    torch_params = {
        "w1": 0.1 * jax.random.normal(k_w1, (OUTPUT_DIM, INPUT_DIM, 3), jnp.float32),
        "b1": 0.1 * jax.random.normal(k_b1, (OUTPUT_DIM,), jnp.float32),
        "w2": 0.1 * jax.random.normal(k_w2, (OUTPUT_DIM, OUTPUT_DIM, 3), jnp.float32),
        "b2": 0.1 * jax.random.normal(k_b2, (OUTPUT_DIM,), jnp.float32),
        "gamma": jnp.ones((OUTPUT_DIM,), jnp.float32),   # nn.LayerNorm defaults
        "beta": jnp.zeros((OUTPUT_DIM,), jnp.float32),
    }
    x = jax.random.normal(k_x, (B, T, INPUT_DIM), jnp.float32)

    prep = prepare_params(torch_params)                  # hoisted: done once, reused every call
    fwd = jax.jit(functools.partial(conv_subsampling_forward, output_dim=OUTPUT_DIM))

    out = jax.block_until_ready(fwd(x, prep))
    ref = jax.block_until_ready(reference_forward(x, torch_params))

    assert out.shape == ref.shape, (out.shape, ref.shape)
    assert jnp.allclose(out, ref, atol=1e-4, rtol=1e-4), "mismatch vs reference"

    print("KERNEL_OK")
</pallas_src>

<mosaic_0001>
module attributes {stable_mosaic.version = 11 : i64} {
  func.func @_conv_subsample_kernel(%arg0: i32, %arg1: i32, %arg2: memref<1x16x128xf32, #tpu.memory_space<vmem>>, %arg3: memref<1x16x128xf32, #tpu.memory_space<vmem>>, %arg4: memref<1x16x128xf32, #tpu.memory_space<vmem>>, %arg5: memref<1x16x128xf32, #tpu.memory_space<vmem>>, %arg6: memref<1x16x128xf32, #tpu.memory_space<vmem>>, %arg7: memref<3x128x128xf32, #tpu.memory_space<vmem>>, %arg8: memref<1x128xf32, #tpu.memory_space<vmem>>, %arg9: memref<3x128x128xf32, #tpu.memory_space<vmem>>, %arg10: memref<1x128xf32, #tpu.memory_space<vmem>>, %arg11: memref<1x128xf32, #tpu.memory_space<vmem>>, %arg12: memref<1x128xf32, #tpu.memory_space<vmem>>, %arg13: memref<1x8x128xf32, #tpu.memory_space<vmem>>) attributes {dimension_semantics = [#tpu.dimension_semantics<parallel>, #tpu.dimension_semantics<parallel>], iteration_bounds = array<i64: 2, 1>, scalar_prefetch = 0 : i64, scratch_operands = 0 : i64, tpu.core_type = #tpu.core_type<tc>, window_params = [{transform_indices = @transform_0, window_bounds = array<i64: 1, 16, 128>}, {transform_indices = @transform_1, window_bounds = array<i64: 1, 16, 128>}, {transform_indices = @transform_2, window_bounds = array<i64: 1, 16, 128>}, {transform_indices = @transform_3, window_bounds = array<i64: 1, 16, 128>}, {transform_indices = @transform_4, window_bounds = array<i64: 1, 16, 128>}, {pipeline_mode = #tpu.pipeline_mode<synchronous>, transform_indices = @transform_5, window_bounds = array<i64: 3, 128, 128>}, {pipeline_mode = #tpu.pipeline_mode<synchronous>, transform_indices = @transform_6, window_bounds = array<i64: 1, 128>}, {pipeline_mode = #tpu.pipeline_mode<synchronous>, transform_indices = @transform_7, window_bounds = array<i64: 3, 128, 128>}, {pipeline_mode = #tpu.pipeline_mode<synchronous>, transform_indices = @transform_8, window_bounds = array<i64: 1, 128>}, {pipeline_mode = #tpu.pipeline_mode<synchronous>, transform_indices = @transform_9, window_bounds = array<i64: 1, 128>}, {pipeline_mode = #tpu.pipeline_mode<synchronous>, transform_indices = @transform_10, window_bounds = array<i64: 1, 128>}, {transform_indices = @transform_11, window_bounds = array<i64: 1, 8, 128>}]} {
    %c8_i32 = arith.constant 8 : i32
    %0 = arith.muli %arg1, %c8_i32 : i32
    %1 = tpu.assume_multiple %0, 8 : i32
    %c0 = arith.constant 0 : index
    %c0_0 = arith.constant 0 : index
    %2 = vector.load %arg8[%c0, %c0_0] : memref<1x128xf32, #tpu.memory_space<vmem>>, vector<1x128xf32>
    %c0_1 = arith.constant 0 : index
    %c0_2 = arith.constant 0 : index
    %3 = vector.load %arg10[%c0_1, %c0_2] : memref<1x128xf32, #tpu.memory_space<vmem>>, vector<1x128xf32>
    %c0_3 = arith.constant 0 : index
    %4 = arith.index_cast %1 : i32 to index
    %c0_4 = arith.constant 0 : index
    %5 = vector.load %arg2[%c0_3, %4, %c0_4] : memref<1x16x128xf32, #tpu.memory_space<vmem>>, vector<1x8x128xf32>
    %6 = vector.shape_cast %5 : vector<1x8x128xf32> to vector<8x128xf32>
    %c0_5 = arith.constant 0 : index
    %c0_6 = arith.constant 0 : index
    %c0_7 = arith.constant 0 : index
    %7 = vector.load %arg7[%c0_5, %c0_6, %c0_7] : memref<3x128x128xf32, #tpu.memory_space<vmem>>, vector<1x128x128xf32>
    %8 = vector.shape_cast %7 : vector<1x128x128xf32> to vector<128x128xf32>
    %cst = arith.constant dense<0.000000e+00> : vector<8x128xf32>
    %9 = tpu.matmul %6, %8, %cst {dimension_numbers = #tpu.dot_dimension_numbers<[1], [0], [0], [1], [0, 0, 1, 1], [], []>} : vector<8x128xf32>, vector<128x128xf32>, vector<8x128xf32> -> vector<8x128xf32>
    %c0_8 = arith.constant 0 : index
    %10 = arith.index_cast %1 : i32 to index
    %c0_9 = arith.constant 0 : index
    %11 = vector.load %arg3[%c0_8, %10, %c0_9] : memref<1x16x128xf32, #tpu.memory_space<vmem>>, vector<1x8x128xf32>
    %12 = vector.shape_cast %11 : vector<1x8x128xf32> to vector<8x128xf32>
    %c1 = arith.constant 1 : index
    %c0_10 = arith.constant 0 : index
    %c0_11 = arith.constant 0 : index
    %13 = vector.load %arg7[%c1, %c0_10, %c0_11] : memref<3x128x128xf32, #tpu.memory_space<vmem>>, vector<1x128x128xf32>
    %14 = vector.shape_cast %13 : vector<1x128x128xf32> to vector<128x128xf32>
    %cst_12 = arith.constant dense<0.000000e+00> : vector<8x128xf32>
    %15 = tpu.matmul %12, %14, %cst_12 {dimension_numbers = #tpu.dot_dimension_numbers<[1], [0], [0], [1], [0, 0, 1, 1], [], []>} : vector<8x128xf32>, vector<128x128xf32>, vector<8x128xf32> -> vector<8x128xf32>
    %16 = arith.addf %9, %15 : vector<8x128xf32>
    %c0_13 = arith.constant 0 : index
    %17 = arith.index_cast %1 : i32 to index
    %c0_14 = arith.constant 0 : index
    %18 = vector.load %arg4[%c0_13, %17, %c0_14] : memref<1x16x128xf32, #tpu.memory_space<vmem>>, vector<1x8x128xf32>
    %19 = vector.shape_cast %18 : vector<1x8x128xf32> to vector<8x128xf32>
    %c2 = arith.constant 2 : index
    %c0_15 = arith.constant 0 : index
    %c0_16 = arith.constant 0 : index
    %20 = vector.load %arg7[%c2, %c0_15, %c0_16] : memref<3x128x128xf32, #tpu.memory_space<vmem>>, vector<1x128x128xf32>
    %21 = vector.shape_cast %20 : vector<1x128x128xf32> to vector<128x128xf32>
    %cst_17 = arith.constant dense<0.000000e+00> : vector<8x128xf32>
    %22 = tpu.matmul %19, %21, %cst_17 {dimension_numbers = #tpu.dot_dimension_numbers<[1], [0], [0], [1], [0, 0, 1, 1], [], []>} : vector<8x128xf32>, vector<128x128xf32>, vector<8x128xf32> -> vector<8x128xf32>
    %23 = arith.addf %16, %22 : vector<8x128xf32>
    %24 = vector.broadcast %2 : vector<1x128xf32> to vector<8x128xf32>
    %25 = arith.addf %23, %24 : vector<8x128xf32>
    %cst_18 = arith.constant 0.000000e+00 : f32
    %26 = vector.broadcast %cst_18 : f32 to vector<8x128xf32>
    %27 = arith.maximumf %25, %26 : vector<8x128xf32>
    %c0_19 = arith.constant 0 : index
    %28 = arith.index_cast %1 : i32 to index
    %c0_20 = arith.constant 0 : index
    %29 = vector.load %arg5[%c0_19, %28, %c0_20] : memref<1x16x128xf32, #tpu.memory_space<vmem>>, vector<1x9x128xf32>
    %30 = vector.shape_cast %29 : vector<1x9x128xf32> to vector<9x128xf32>
    %c0_21 = arith.constant 0 : index
    %c0_22 = arith.constant 0 : index
    %c0_23 = arith.constant 0 : index
    %31 = vector.load %arg7[%c0_21, %c0_22, %c0_23] : memref<3x128x128xf32, #tpu.memory_space<vmem>>, vector<1x128x128xf32>
    %32 = vector.shape_cast %31 : vector<1x128x128xf32> to vector<128x128xf32>
    %cst_24 = arith.constant dense<0.000000e+00> : vector<9x128xf32>
    %33 = tpu.matmul %30, %32, %cst_24 {dimension_numbers = #tpu.dot_dimension_numbers<[1], [0], [0], [1], [0, 0, 1, 1], [], []>} : vector<9x128xf32>, vector<128x128xf32>, vector<9x128xf32> -> vector<9x128xf32>
    %c0_25 = arith.constant 0 : index
    %34 = arith.index_cast %1 : i32 to index
    %c0_26 = arith.constant 0 : index
    %35 = vector.load %arg6[%c0_25, %34, %c0_26] : memref<1x16x128xf32, #tpu.memory_space<vmem>>, vector<1x9x128xf32>
    %36 = vector.shape_cast %35 : vector<1x9x128xf32> to vector<9x128xf32>
    %c1_27 = arith.constant 1 : index
    %c0_28 = arith.constant 0 : index
    %c0_29 = arith.constant 0 : index
    %37 = vector.load %arg7[%c1_27, %c0_28, %c0_29] : memref<3x128x128xf32, #tpu.memory_space<vmem>>, vector<1x128x128xf32>
    %38 = vector.shape_cast %37 : vector<1x128x128xf32> to vector<128x128xf32>
    %cst_30 = arith.constant dense<0.000000e+00> : vector<9x128xf32>
    %39 = tpu.matmul %36, %38, %cst_30 {dimension_numbers = #tpu.dot_dimension_numbers<[1], [0], [0], [1], [0, 0, 1, 1], [], []>} : vector<9x128xf32>, vector<128x128xf32>, vector<9x128xf32> -> vector<9x128xf32>
    %40 = arith.addf %33, %39 : vector<9x128xf32>
    %c0_31 = arith.constant 0 : index
    %41 = arith.index_cast %1 : i32 to index
    %c0_32 = arith.constant 0 : index
    %42 = vector.load %arg2[%c0_31, %41, %c0_32] : memref<1x16x128xf32, #tpu.memory_space<vmem>>, vector<1x9x128xf32>
    %43 = vector.shape_cast %42 : vector<1x9x128xf32> to vector<9x128xf32>
    %c2_33 = arith.constant 2 : index
    %c0_34 = arith.constant 0 : index
    %c0_35 = arith.constant 0 : index
    %44 = vector.load %arg7[%c2_33, %c0_34, %c0_35] : memref<3x128x128xf32, #tpu.memory_space<vmem>>, vector<1x128x128xf32>
    %45 = vector.shape_cast %44 : vector<1x128x128xf32> to vector<128x128xf32>
    %cst_36 = arith.constant dense<0.000000e+00> : vector<9x128xf32>
    %46 = tpu.matmul %43, %45, %cst_36 {dimension_numbers = #tpu.dot_dimension_numbers<[1], [0], [0], [1], [0, 0, 1, 1], [], []>} : vector<9x128xf32>, vector<128x128xf32>, vector<9x128xf32> -> vector<9x128xf32>
    %47 = arith.addf %40, %46 : vector<9x128xf32>
    %48 = vector.broadcast %2 : vector<1x128xf32> to vector<9x128xf32>
    %49 = arith.addf %47, %48 : vector<9x128xf32>
    %cst_37 = arith.constant 0.000000e+00 : f32
    %50 = vector.broadcast %cst_37 : f32 to vector<9x128xf32>
    %51 = arith.maximumf %49, %50 : vector<9x128xf32>
    %52 = tpu.iota {dimensions = array<i32: 0>} : vector<9x1xi32>
    %53 = vector.broadcast %1 : i32 to vector<9x1xi32>
    %54 = arith.addi %53, %52 : vector<9x1xi32>
    %c2_i32 = arith.constant 2 : i32
    %55 = vector.broadcast %c2_i32 : i32 to vector<9x1xi32>
    %56 = arith.muli %55, %54 : vector<9x1xi32>
    %c1_i32 = arith.constant 1 : i32
    %57 = vector.broadcast %c1_i32 : i32 to vector<9x1xi32>
    %58 = arith.subi %56, %57 : vector<9x1xi32>
    %c0_i32 = arith.constant 0 : i32
    %59 = vector.broadcast %c0_i32 : i32 to vector<9x1xi32>
    %60 = arith.cmpi sge, %58, %59 : vector<9x1xi32>
    %c8_i32_38 = arith.constant 8 : i32
    %61 = vector.broadcast %c8_i32_38 : i32 to vector<9x1xi32>
    %62 = arith.cmpi slt, %58, %61 : vector<9x1xi32>
    %63 = arith.andi %60, %62 : vector<9x1xi1>
    %cst_39 = arith.constant 0.000000e+00 : f32
    %64 = vector.shape_cast %63 : vector<9x1xi1> to vector<9x1xi1>
    %65 = vector.broadcast %64 : vector<9x1xi1> to vector<9x128xi1>
    %66 = vector.broadcast %cst_39 : f32 to vector<9x128xf32>
    %67 = arith.select %65, %51, %66 : vector<9x128xi1>, vector<9x128xf32>
    %68 = vector.extract_strided_slice %67 {offsets = [0, 0], sizes = [8, 128], strides = [1, 1]} : vector<9x128xf32> to vector<8x128xf32>
    %69 = vector.extract_strided_slice %67 {offsets = [1, 0], sizes = [8, 128], strides = [1, 1]} : vector<9x128xf32> to vector<8x128xf32>
    %c0_40 = arith.constant 0 : index
    %c0_41 = arith.constant 0 : index
    %c0_42 = arith.constant 0 : index
    %70 = vector.load %arg9[%c0_40, %c0_41, %c0_42] : memref<3x128x128xf32, #tpu.memory_space<vmem>>, vector<1x128x128xf32>
    %71 = vector.shape_cast %70 : vector<1x128x128xf32> to vector<128x128xf32>
    %cst_43 = arith.constant dense<0.000000e+00> : vector<8x128xf32>
    %72 = tpu.matmul %68, %71, %cst_43 {dimension_numbers = #tpu.dot_dimension_numbers<[1], [0], [0], [1], [0, 0, 1, 1], [], []>} : vector<8x128xf32>, vector<128x128xf32>, vector<8x128xf32> -> vector<8x128xf32>
    %c1_44 = arith.constant 1 : index
    %c0_45 = arith.constant 0 : index
    %c0_46 = arith.constant 0 : index
    %73 = vector.load %arg9[%c1_44, %c0_45, %c0_46] : memref<3x128x128xf32, #tpu.memory_space<vmem>>, vector<1x128x128xf32>
    %74 = vector.shape_cast %73 : vector<1x128x128xf32> to vector<128x128xf32>
    %cst_47 = arith.constant dense<0.000000e+00> : vector<8x128xf32>
    %75 = tpu.matmul %27, %74, %cst_47 {dimension_numbers = #tpu.dot_dimension_numbers<[1], [0], [0], [1], [0, 0, 1, 1], [], []>} : vector<8x128xf32>, vector<128x128xf32>, vector<8x128xf32> -> vector<8x128xf32>
    %76 = arith.addf %72, %75 : vector<8x128xf32>
    %c2_48 = arith.constant 2 : index
    %c0_49 = arith.constant 0 : index
    %c0_50 = arith.constant 0 : index
    %77 = vector.load %arg9[%c2_48, %c0_49, %c0_50] : memref<3x128x128xf32, #tpu.memory_space<vmem>>, vector<1x128x128xf32>
    %78 = vector.shape_cast %77 : vector<1x128x128xf32> to vector<128x128xf32>
    %cst_51 = arith.constant dense<0.000000e+00> : vector<8x128xf32>
    %79 = tpu.matmul %69, %78, %cst_51 {dimension_numbers = #tpu.dot_dimension_numbers<[1], [0], [0], [1], [0, 0, 1, 1], [], []>} : vector<8x128xf32>, vector<128x128xf32>, vector<8x128xf32> -> vector<8x128xf32>
    %80 = arith.addf %76, %79 : vector<8x128xf32>
    %81 = vector.broadcast %3 : vector<1x128xf32> to vector<8x128xf32>
    %82 = arith.addf %80, %81 : vector<8x128xf32>
    %cst_52 = arith.constant 0.000000e+00 : f32
    %83 = vector.broadcast %cst_52 : f32 to vector<8x128xf32>
    %84 = arith.maximumf %82, %83 : vector<8x128xf32>
    %85 = tpu.iota {dimensions = array<i32: 1>} : vector<1x128xi32>
    %c16_i32 = arith.constant 16 : i32
    %86 = vector.broadcast %c16_i32 : i32 to vector<1x128xi32>
    %87 = arith.cmpi slt, %85, %86 : vector<1x128xi32>
    %cst_53 = arith.constant dense<0.000000e+00> : vector<8xf32>
    %88 = vector.multi_reduction <add>, %84, %cst_53 [1] : vector<8x128xf32> to vector<8xf32>
    %89 = vector.shape_cast %88 : vector<8xf32> to vector<8x1xf32>
    %cst_54 = arith.constant 6.250000e-02 : f32
    %90 = vector.broadcast %cst_54 : f32 to vector<8x1xf32>
    %91 = arith.mulf %89, %90 : vector<8x1xf32>
    %92 = vector.broadcast %91 : vector<8x1xf32> to vector<8x128xf32>
    %93 = arith.subf %84, %92 : vector<8x128xf32>
    %94 = arith.mulf %93, %93 : vector<8x128xf32>
    %cst_55 = arith.constant 0.000000e+00 : f32
    %95 = vector.shape_cast %87 : vector<1x128xi1> to vector<1x128xi1>
    %96 = vector.broadcast %95 : vector<1x128xi1> to vector<8x128xi1>
    %97 = vector.broadcast %cst_55 : f32 to vector<8x128xf32>
    %98 = arith.select %96, %94, %97 : vector<8x128xi1>, vector<8x128xf32>
    %cst_56 = arith.constant dense<0.000000e+00> : vector<8xf32>
    %99 = vector.multi_reduction <add>, %98, %cst_56 [1] : vector<8x128xf32> to vector<8xf32>
    %100 = vector.shape_cast %99 : vector<8xf32> to vector<8x1xf32>
    %cst_57 = arith.constant 6.250000e-02 : f32
    %101 = vector.broadcast %cst_57 : f32 to vector<8x1xf32>
    %102 = arith.mulf %100, %101 : vector<8x1xf32>
    %cst_58 = arith.constant 9.99999974E-6 : f32
    %103 = vector.broadcast %cst_58 : f32 to vector<8x1xf32>
    %104 = arith.addf %102, %103 : vector<8x1xf32>
    %105 = math.rsqrt %104 : vector<8x1xf32>
    %106 = vector.broadcast %105 : vector<8x1xf32> to vector<8x128xf32>
    %107 = arith.mulf %93, %106 : vector<8x128xf32>
    %c0_59 = arith.constant 0 : index
    %c0_60 = arith.constant 0 : index
    %108 = vector.load %arg11[%c0_59, %c0_60] : memref<1x128xf32, #tpu.memory_space<vmem>>, vector<1x128xf32>
    %109 = vector.broadcast %108 : vector<1x128xf32> to vector<8x128xf32>
    %110 = arith.mulf %107, %109 : vector<8x128xf32>
    %c0_61 = arith.constant 0 : index
    %c0_62 = arith.constant 0 : index
    %111 = vector.load %arg12[%c0_61, %c0_62] : memref<1x128xf32, #tpu.memory_space<vmem>>, vector<1x128xf32>
    %112 = vector.broadcast %111 : vector<1x128xf32> to vector<8x128xf32>
    %113 = arith.addf %110, %112 : vector<8x128xf32>
    %c0_63 = arith.constant 0 : index
    %c0_64 = arith.constant 0 : index
    %c0_65 = arith.constant 0 : index
    %114 = vector.load %arg13[%c0_63, %c0_64, %c0_65] : memref<1x8x128xf32, #tpu.memory_space<vmem>>, vector<1x8x128xf32>
    %115 = vector.shape_cast %114 : vector<1x8x128xf32> to vector<8x128xf32>
    %116 = vector.shape_cast %113 : vector<8x128xf32> to vector<1x8x128xf32>
    tpu.vector_store %arg13[%c0_63, %c0_64, %c0_65], %116 {strides = array<i32>} : memref<1x8x128xf32, #tpu.memory_space<vmem>>, vector<1x8x128xf32>,
    return
  }
  func.func @transform_0(%arg0: i32, %arg1: i32) -> (i32, i32, i32) {
    %c0_i32 = arith.constant 0 : i32
    %c0_i32_0 = arith.constant 0 : i32
    %c0_i32_1 = arith.constant 0 : i32
    return %arg0, %c0_i32, %c0_i32_0 : i32, i32, i32
  }
  func.func @transform_1(%arg0: i32, %arg1: i32) -> (i32, i32, i32) {
    %c0_i32 = arith.constant 0 : i32
    %c0_i32_0 = arith.constant 0 : i32
    %c0_i32_1 = arith.constant 0 : i32
    return %arg0, %c0_i32, %c0_i32_0 : i32, i32, i32
  }
  func.func @transform_2(%arg0: i32, %arg1: i32) -> (i32, i32, i32) {
    %c0_i32 = arith.constant 0 : i32
    %c0_i32_0 = arith.constant 0 : i32
    %c0_i32_1 = arith.constant 0 : i32
    return %arg0, %c0_i32, %c0_i32_0 : i32, i32, i32
  }
  func.func @transform_3(%arg0: i32, %arg1: i32) -> (i32, i32, i32) {
    %c0_i32 = arith.constant 0 : i32
    %c0_i32_0 = arith.constant 0 : i32
    %c0_i32_1 = arith.constant 0 : i32
    return %arg0, %c0_i32, %c0_i32_0 : i32, i32, i32
  }
  func.func @transform_4(%arg0: i32, %arg1: i32) -> (i32, i32, i32) {
    %c0_i32 = arith.constant 0 : i32
    %c0_i32_0 = arith.constant 0 : i32
    %c0_i32_1 = arith.constant 0 : i32
    return %arg0, %c0_i32, %c0_i32_0 : i32, i32, i32
  }
  func.func @transform_5(%arg0: i32, %arg1: i32) -> (i32, i32, i32) {
    %c0_i32 = arith.constant 0 : i32
    %c0_i32_0 = arith.constant 0 : i32
    %c0_i32_1 = arith.constant 0 : i32
    %c0_i32_2 = arith.constant 0 : i32
    return %c0_i32, %c0_i32_0, %c0_i32_1 : i32, i32, i32
  }
  func.func @transform_6(%arg0: i32, %arg1: i32) -> (i32, i32) {
    %c0_i32 = arith.constant 0 : i32
    %c0_i32_0 = arith.constant 0 : i32
    %c0_i32_1 = arith.constant 0 : i32
    return %c0_i32, %c0_i32_0 : i32, i32
  }
  func.func @transform_7(%arg0: i32, %arg1: i32) -> (i32, i32, i32) {
    %c0_i32 = arith.constant 0 : i32
    %c0_i32_0 = arith.constant 0 : i32
    %c0_i32_1 = arith.constant 0 : i32
    %c0_i32_2 = arith.constant 0 : i32
    return %c0_i32, %c0_i32_0, %c0_i32_1 : i32, i32, i32
  }
  func.func @transform_8(%arg0: i32, %arg1: i32) -> (i32, i32) {
    %c0_i32 = arith.constant 0 : i32
    %c0_i32_0 = arith.constant 0 : i32
    %c0_i32_1 = arith.constant 0 : i32
    return %c0_i32, %c0_i32_0 : i32, i32
  }
  func.func @transform_9(%arg0: i32, %arg1: i32) -> (i32, i32) {
    %c0_i32 = arith.constant 0 : i32
    %c0_i32_0 = arith.constant 0 : i32
    %c0_i32_1 = arith.constant 0 : i32
    return %c0_i32, %c0_i32_0 : i32, i32
  }
  func.func @transform_10(%arg0: i32, %arg1: i32) -> (i32, i32) {
    %c0_i32 = arith.constant 0 : i32
    %c0_i32_0 = arith.constant 0 : i32
    %c0_i32_1 = arith.constant 0 : i32
    return %c0_i32, %c0_i32_0 : i32, i32
  }
  func.func @transform_11(%arg0: i32, %arg1: i32) -> (i32, i32, i32) {
    %c0_i32 = arith.constant 0 : i32
    %c0_i32_0 = arith.constant 0 : i32
    return %arg0, %arg1, %c0_i32 : i32, i32, i32
  }
}

</mosaic_0001>

<bundles_post_ra>
// kernel: conv_subsampling_forward.1
= control target key start
LH: loop header
LB: loop body
LE: loop exit
PB: predicated region body
PF: predicated region fallthrough
CT: control target
= control target key end

     0   :  { %16 = vsyncpa [#allocation3], 0  ;;  %s1258_s17 = smov 0   ;;  %s1260_s18 = smov 0   ;;  %s1620_s0 = inlined_call_operand.vmem [shape: f32[2,16,128], index: 0, kind: input, shape index: {}]   ;;  %s1621_s1 = inlined_call_operand.vmem [shape: f32[2,16,128], index: 1, kind: input, shape index: {}]   ;;  %s1622_s2 = inlined_call_operand.vmem [shape: f32[2,16,128], index: 2, kind: input, shape index: {}]   ;;  %s1623_s3 = inlined_call_operand.vmem [shape: f32[2,16,128], index: 3, kind: input, shape index: {}]   ;;  %s1624_s4 = inlined_call_operand.vmem [shape: f32[2,16,128], index: 4, kind: input, shape index: {}]   ;;  %s1625_s5 = inlined_call_operand.vmem [shape: f32[3,128,128], index: 5, kind: input, shape index: {}]   ;;  %s1626_s6 = inlined_call_operand.vmem [shape: f32[1,128], index: 6, kind: input, shape index: {}]   ;;  %s1627_s7 = inlined_call_operand.hbm [shape: f32[3,128,128], index: 7, kind: input, shape index: {}]   ;;  %s1628_s8 = inlined_call_operand.vmem [shape: f32[1,128], index: 8, kind: input, shape index: {}]   ;;  %s1629_s9 = inlined_call_operand.vmem [shape: f32[1,128], index: 9, kind: input, shape index: {}]   ;;  %s1630_s10 = inlined_call_operand.vmem [shape: f32[1,128], index: 10, kind: input, shape index: {}]   ;;  %s1631_s11 = inlined_call_operand.vmem [shape: f32[2,8,128], index: 11, kind: output, shape index: {}]  }
   0x1   :  { %s1262_s19 = smov 0  }
   0x2 LB: > { %s1034_s20 = sadd.s32 4294967295, %s1193_s19   ;;  %s34_s21 = sadd.s32 1, %s1189_s18  ;;  %s1193_s19 = sphi %s1262_s19, %s22_s19   ;;  %s1189_s18 = sphi %s1260_s18, %s1633_s18   ;;  %s1185_s17 = sphi %s1258_s17, %s1632_s17  }
   0x3   : > { %p36_p0 = scmp.ge.s32.totalorder %s34_s21, 2  ;;  %p1036_p1 = scmp.ge.s32.totalorder %s1193_s19, 1 }
   0x4   : > { %p323_p2 = scmp.lt.s32.totalorder %s1193_s19, 3  ;;  %p1102_p4 = scmp.eq.s32.totalorder %s1034_s20, 0 }
   0x5   : > { %s1635_s21 = smov (%p36_p0, %s34_s21), 0  ;;  %s340_s24 = sshll.u32 %s1627_s7, 4  ;;  %s341_s24 = int_to_ptr.hbm [resolvable:$true] %s340_s24 }
   0x6   : > { %p324_p3 = pnand %p1036_p1, %p323_p2  ;;  %s1195_s25 = smov [#allocation2]  }
   0x7   : > { %s342_s26 = sshll.u32 %s1195_s25, 4  ;;  %s1196_s27 = smov 128   ;;  %s343_s26 = int_to_ptr.vmem [resolvable:$true] %s342_s26 }
   0x8   : > { %p1098_p5 = pneg %p324_p3  ;;  %s1197_s28 = smov 8  }
   0x9   : > { %407 = sbr.rel (%p324_p3) target bundleno = 625 (0x271), region = 64 }
   0xa   : > { %p1099_p6 = pnand %p1102_p4, %p1098_p5 }
   0xc   : > { %1101 = dma.hbm_to_vmem [thread:$0]  (!%p1099_p6), %s341_s24, 6144, %s343_s26, [#allocation3], %s1196_s27, %s1196_s27, %s1197_s28  }
   0xe   : > { %1180 = dma.done.wait (%p1102_p4), [#allocation3], 6144  }
   0xf   : > { %1182 = vsyncadd (%p1102_p4), [#allocation3], 4294961152  ;;  %v1067_v0 = vld [vmem:[%s1625_s5 + $0xf8] sm:$0xff]  ;;  %v1066_v1 = vld [vmem:[%s1625_s5 + $0xf0] sm:$0xff]  ;;  %p470_p7 = scmp.lt.s32.totalorder %s1185_s17, 1  ;;  %vm824_vm6 = vcmask 1046528  }
  0x10   : > { %v1291_v2 = vld [vmem:[%s1625_s5 + $0x78] sm:$0xff]  ;;  %542 = vmatpush.msra.mxu0 %v1067_v0  ;;  %v1297_v3 = vld [vmem:[%s1625_s5 + $0x70] sm:$0xff]  ;;  %v1065_v4 = vld [vmem:[%s1625_s5 + $0xe8] sm:$0xff]  ;;  %633 = vmatpush.msra.mxu3 %v1067_v0 }
  0x11   : > { %562 = vmatpush.msra.mxu1 %v1291_v2  ;;  %v1305_v5 = vld [vmem:[%s1625_s5 + $0x68] sm:$0xff]  ;;  %v1064_v6 = vld [vmem:[%s1625_s5 + $0xe0] sm:$0xff]  ;;  %v1063_v8 = vld [vmem:[%s1625_s5 + $0xd8] sm:$0xff]  ;;  %s1637_s17 = smov (!%p470_p7, %s1185_s17), 1 }
  0x12   : > { %543 = vmatpush.msra.mxu0 %v1066_v1  ;;  %v1314_v7 = vld [vmem:[%s1625_s5 + $0x60] sm:$0xff]  ;;  %634 = vmatpush.msra.mxu3 %v1066_v1  ;;  %v1323_v9 = vld [vmem:[%s1625_s5 + $0x58] sm:$0xff]  ;;  %v1334_v11 = vld [vmem:[%s1625_s5 + $0x170] sm:$0xff]  ;;  %s1487_s20 = sshll.u32 %s1637_s17, 4  ;;  %s1051_s28 = sshll.u32 %s1637_s17, 3 }
  0x13   : > { %563 = vmatpush.msra.mxu1 %v1297_v3  ;;  %v1328_v10 = vld [vmem:[%s1625_s5 + $0x178] sm:$0xff]  ;;  %v1062_v12 = vld [vmem:[%s1625_s5 + $0xd0] sm:$0xff]  ;;  %v1349_v14 = vld [vmem:[%s1625_s5 + $0x168] sm:$0xff]  ;;  %s479_s26 = scalar_lea.vmem %s1621_s1, %s1487_s20  ;;  %s1513_s14 = scalar_lea.vmem %s1620_s0, %s1487_s20 }
  0x14   : > { %544 = vmatpush.msra.mxu0 %v1065_v4  ;;  %635 = vmatpush.msra.mxu3 %v1065_v4  ;;  %v1342_v13 = vld [vmem:[%s1625_s5 + $0x50] sm:$0xff]  ;;  %v1061_v15 = vld [vmem:[%s1625_s5 + $0xc8] sm:$0xff]  ;;  %v1364_v17 = vld [vmem:[%s1625_s5 + $0x160] sm:$0xff]  ;;  %s484_s12 = scalar_lea.vmem %s1622_s2, %s1487_s20  ;;  %s489_s23 = scalar_lea.vmem %s1623_s3, %s1487_s20 }
  0x15   : > { %564 = vmatpush.msra.mxu1 %v1305_v5  ;;  %601 = vmatpush.msra.mxu2 %v1328_v10  ;;  %v1357_v16 = vld [vmem:[%s1625_s5 + $0x48] sm:$0xff]  ;;  %v1060_v18 = vld [vmem:[%s1625_s5 + $0xc0] sm:$0xff]  ;;  %v1379_v20 = vld [vmem:[%s1625_s5 + $0x158] sm:$0xff]  ;;  %s501_s15 = scalar_lea.vmem %s1631_s11, %s1051_s28 }
  0x16   : > { %545 = vmatpush.msra.mxu0 %v1064_v6  ;;  %636 = vmatpush.msra.mxu3 %v1064_v6  ;;  %v1372_v19 = vld [vmem:[%s1625_s5 + $0x40] sm:$0xff]  ;;  %v1059_v21 = vld [vmem:[%s1625_s5 + $0xb8] sm:$0xff]  ;;  %v1058_v23 = vld [vmem:[%s1625_s5 + $0xb0] sm:$0xff] }
  0x17   : > { %565 = vmatpush.msra.mxu1 %v1314_v7  ;;  %602 = vmatpush.msra.mxu2 %v1334_v11  ;;  %v1387_v22 = vld [vmem:[%s1625_s5 + $0x38] sm:$0xff]  ;;  %v1397_v24 = vld [vmem:[%s1625_s5 + $0x150] sm:$0xff]  ;;  %v1409_v26 = vld [vmem:[%s1625_s5 + $0x148] sm:$0xff] }
  0x18   : > { %546 = vmatpush.msra.mxu0 %v1063_v8  ;;  %637 = vmatpush.msra.mxu3 %v1063_v8  ;;  %v1402_v25 = vld [vmem:[%s1625_s5 + $0x30] sm:$0xff]  ;;  %v1057_v27 = vld [vmem:[%s1625_s5 + $0xa8] sm:$0xff]  ;;  %v1425_v29 = vld [vmem:[%s1625_s5 + $0x140] sm:$0xff] }
  0x19   : > { %566 = vmatpush.msra.mxu1 %v1323_v9  ;;  %603 = vmatpush.msra.mxu2 %v1349_v14  ;;  %v1417_v28 = vld [vmem:[%s1625_s5 + $0x28] sm:$0xff]  ;;  %v1056_v30 = vld [vmem:[%s1625_s5 + $0xa0] sm:$0xff]  ;;  %v1440_v32 = vld [vmem:[%s1625_s5 + $0x138] sm:$0xff] }
  0x1a   : > { %547 = vmatpush.msra.mxu0 %v1062_v12  ;;  %638 = vmatpush.msra.mxu3 %v1062_v12  ;;  %v1433_v31 = vld [vmem:[%s1625_s5 + $0x20] sm:$0xff]  ;;  %v1055_v33 = vld [vmem:[%s1625_s5 + $0x98] sm:$0xff]  ;;  %v1460_v35 = vld [vmem:[%s1625_s5 + $0x130] sm:$0xff] }
  0x1b   : > { %567 = vmatpush.msra.mxu1 %v1342_v13  ;;  %604 = vmatpush.msra.mxu2 %v1364_v17  ;;  %v1448_v34 = vld [vmem:[%s1625_s5 + $0x18] sm:$0xff]  ;;  %v1054_v36 = vld [vmem:[%s1625_s5 + $0x90] sm:$0xff]  ;;  %v1475_v38 = vld [vmem:[%s1625_s5 + $0x128] sm:$0xff] }
  0x1c   : > { %548 = vmatpush.msra.mxu0 %v1061_v15  ;;  %639 = vmatpush.msra.mxu3 %v1061_v15  ;;  %v1468_v37 = vld [vmem:[%s1625_s5 + $0x10] sm:$0xff]  ;;  %v1053_v39 = vld [vmem:[%s1625_s5 + $0x88] sm:$0xff]  ;;  %v1493_v41 = vld [vmem:[%s1625_s5 + $0x120] sm:$0xff] }
  0x1d   : > { %568 = vmatpush.msra.mxu1 %v1357_v16  ;;  %605 = vmatpush.msra.mxu2 %v1379_v20  ;;  %v1483_v40 = vld [vmem:[%s1625_s5 + $0x8] sm:$0xff]  ;;  %v1052_v42 = vld [vmem:[%s1625_s5 + $0x80] sm:$0xff]  ;;  %v1519_v44 = vld [vmem:[%s1625_s5 + $0x118] sm:$0xff] }
  0x1e   : > { %549 = vmatpush.msra.mxu0 %v1060_v18  ;;  %640 = vmatpush.msra.mxu3 %v1060_v18  ;;  %v1505_v43 = vld [vmem:[%s1625_s5] sm:$0xff]  ;;  %v1527_v46 = vld [vmem:[%s1625_s5 + $0x110] sm:$0xff]  ;;  %v1544_v48 = vld [vmem:[%s1625_s5 + $0x108] sm:$0xff] }
  0x1f   : > { %569 = vmatpush.msra.mxu1 %v1372_v19  ;;  %606 = vmatpush.msra.mxu2 %v1397_v24  ;;  %v524_v45 = vld [vmem:[%s479_s26] sm:$0xff]  ;;  %s1537_s26 = scalar_lea.vmem %s1624_s4, %s1487_s20  ;;  %v764_v52 = vld [vmem:[#allocation2 + $0xf8] sm:$0xff]  ;;  %v763_v54 = vld [vmem:[#allocation2 + $0xf0] sm:$0xff] }
  0x20   : > { %550 = vmatpush.msra.mxu0 %v1059_v21  ;;  %641 = vmatpush.msra.mxu3 %v1059_v21  ;;  %v1530_v47 = vld [vmem:[%s1513_s14] sm:$0xff]  ;;  %v747_v53 = vld [vmem:[#allocation2 + $0x78] sm:$0xff]  ;;  %v746_v55 = vld [vmem:[#allocation2 + $0x70] sm:$0xff] }
  0x21   : > { %570 = vmatpush.msra.mxu1 %v1387_v22  ;;  %607 = vmatpush.msra.mxu2 %v1409_v26  ;;  %v1557_v49 = vld [vmem:[%s1625_s5 + $0x100] sm:$0xff]  ;;  %v632_v56 = vld [vmem:[%s1537_s26 + $0x8] sm:$0x1]  ;;  %v760_v60 = vld [vmem:[#allocation2 + $0xd8] sm:$0xff] }
  0x22   : > { %551 = vmatpush.msra.mxu0 %v1058_v23  ;;  %642 = vmatpush.msra.mxu3 %v1058_v23  ;;  %v631_v50 = vld [vmem:[%s1537_s26] sm:$0xff]  ;;  %v762_v57 = vld [vmem:[#allocation2 + $0xe8] sm:$0xff]  ;;  %v759_v62 = vld [vmem:[#allocation2 + $0xd0] sm:$0xff] }
  0x23   : > { %571 = vmatpush.msra.mxu1 %v1402_v25  ;;  %608 = vmatpush.msra.mxu2 %v1425_v29  ;;  %v583_v51 = vld [vmem:[%s484_s12] sm:$0xff]  ;;  %v745_v59 = vld [vmem:[#allocation2 + $0x68] sm:$0xff]  ;;  %v743_v63 = vld [vmem:[#allocation2 + $0x58] sm:$0xff] }
  0x24   : > { %552 = vmatpush.msra.mxu0 %v1057_v27  ;;  %643 = vmatpush.msra.mxu3 %v1057_v27  ;;  %v761_v58 = vld [vmem:[#allocation2 + $0xe0] sm:$0xff]  ;;  %v758_v0 = vld [vmem:[#allocation2 + $0xc8] sm:$0xff]  ;;  %v742_v1 = vld [vmem:[#allocation2 + $0x50] sm:$0xff] }
  0x25   : > { %572 = vmatpush.msra.mxu1 %v1417_v28  ;;  %609 = vmatpush.msra.mxu2 %v1440_v32  ;;  %v744_v61 = vld [vmem:[#allocation2 + $0x60] sm:$0xff]  ;;  %v756_v4 = vld [vmem:[#allocation2 + $0xb8] sm:$0xff]  ;;  %v738_v18 = vld [vmem:[#allocation2 + $0x30] sm:$0xff] }
  0x26   : > { %553 = vmatpush.msra.mxu0 %v1056_v30  ;;  %644 = vmatpush.msra.mxu3 %v1056_v30  ;;  %v628_v6 = vld [vmem:[%s489_s23] sm:$0xff]  ;;  %v821_v8 = vld [vmem:[#allocation2 + $0x178] sm:$0xff]  ;;  %v737_v21 = vld [vmem:[#allocation2 + $0x28] sm:$0xff] }
  0x27   : > { %573 = vmatpush.msra.mxu1 %v1433_v31  ;;  %610 = vmatpush.msra.mxu2 %v1460_v35  ;;  %v740_v12 = vld [vmem:[#allocation2 + $0x40] sm:$0xff]  ;;  %v739_v15 = vld [vmem:[#allocation2 + $0x38] sm:$0xff]  ;;  %v815_v27 = vld [vmem:[#allocation2 + $0x148] sm:$0xff] }
  0x28   : > { %554 = vmatpush.msra.mxu0 %v1055_v33  ;;  %645 = vmatpush.msra.mxu3 %v1055_v33  ;;  %v749_v23 = vld [vmem:[#allocation2 + $0x80] sm:$0xff]  ;;  %v733_v30 = vld [vmem:[#allocation2 + $0x8] sm:$0xff]  ;;  %v812_v33 = vld [vmem:[#allocation2 + $0x130] sm:$0xff] }
  0x29   : > { %574 = vmatpush.msra.mxu1 %v1448_v34  ;;  %611 = vmatpush.msra.mxu2 %v1475_v38 }
  0x2a   : > { %555 = vmatpush.msra.mxu0 %v1054_v36  ;;  %646 = vmatpush.msra.mxu3 %v1054_v36 }
  0x2b   : > { %575 = vmatpush.msra.mxu1 %v1468_v37  ;;  %612 = vmatpush.msra.mxu2 %v1493_v41 }
  0x2c   : > { %556 = vmatpush.msra.mxu0 %v1053_v39  ;;  %647 = vmatpush.msra.mxu3 %v1053_v39  ;;  %v809_v39 = vld [vmem:[#allocation2 + $0x118] sm:$0xff] }
  0x2d   : > { %576 = vmatpush.msra.mxu1 %v1483_v40  ;;  %613 = vmatpush.msra.mxu2 %v1519_v44 }
  0x2e   : > { %557 = vmatpush.msra.mxu0 %v1052_v42  ;;  %648 = vmatpush.msra.mxu3 %v1052_v42 }
  0x2f   : > { %577 = vmatpush.msra.mxu1 %v1505_v43  ;;  %558 = vmatmul.f32.vlgmr.msra.gmra.mxu0 %v524_v45  ;;  %v806_v45 = vld [vmem:[#allocation2 + $0x100] sm:$0xff] }
  0x30   : > { %656 = vmatpush.msrb.mxu0 %v1291_v2  ;;  %614 = vmatpush.msra.mxu2 %v1527_v46  ;;  %v757_v2 = vld [vmem:[#allocation2 + $0xc0] sm:$0xff] }
  0x31   : > { %681 = vmatpush.msrb.mxu1 %v1328_v10  ;;  %649 = vmatmul.f32.vlgmr.msra.gmra.mxu3 %v631_v50  ;;  %v680_v10 = vld [vmem:[%s1513_s14 + $0x8] sm:$0x1] }
  0x32   : > { %657 = vmatpush.msrb.mxu0 %v1297_v3  ;;  %578 = vmatmul.f32.vlgmr.msra.gmra.mxu1 %v1530_v47  ;;  %v741_v3 = vld [vmem:[#allocation2 + $0x48] sm:$0xff] }
  0x33   : > { %682 = vmatpush.msrb.mxu1 %v1334_v11  ;;  %615 = vmatpush.msra.mxu2 %v1544_v48  ;;  %v753_v11 = vld [vmem:[#allocation2 + $0xa0] sm:$0xff] }
  0x34   : > { %658 = vmatpush.msrb.mxu0 %v1305_v5  ;;  %785 = vmatpush.msrb.mxu3 %v747_v53  ;;  %v755_v5 = vld [vmem:[#allocation2 + $0xb0] sm:$0xff] }
  0x35   : > { %683 = vmatpush.msrb.mxu1 %v1349_v14  ;;  %616 = vmatpush.msra.mxu2 %v1557_v49  ;;  %v752_v14 = vld [vmem:[#allocation2 + $0x98] sm:$0xff] }
  0x36   : > { %659 = vmatpush.msrb.mxu0 %v1314_v7  ;;  %617 = vmatmul.f32.vlgmr.msra.gmra.mxu2 %v583_v51  ;;  %v754_v7 = vld [vmem:[#allocation2 + $0xa8] sm:$0xff] }
  0x37   : > { %684 = vmatpush.msrb.mxu1 %v1364_v17  ;;  %765 = vmatpush.msrb.mxu2 %v764_v52  ;;  %v751_v17 = vld [vmem:[#allocation2 + $0x90] sm:$0xff] }
  0x38   : > { %660 = vmatpush.msrb.mxu0 %v1323_v9  ;;  %786 = vmatpush.msrb.mxu3 %v746_v55  ;;  %v629_v9 = vld [vmem:[%s489_s23 + $0x8] sm:$0x1] }
  0x39   : > { %685 = vmatpush.msrb.mxu1 %v1379_v20  ;;  %766 = vmatpush.msrb.mxu2 %v763_v54  ;;  %v750_v20 = vld [vmem:[#allocation2 + $0x88] sm:$0xff] }
  0x3a   : > { %661 = vmatpush.msrb.mxu0 %v1342_v13  ;;  %652 = vmatmul.f32.gmra.mxu3 %v632_v56  ;;  %v820_v13 = vld [vmem:[#allocation2 + $0x170] sm:$0xff] }
  0x3b   : > { %686 = vmatpush.msrb.mxu1 %v1397_v24  ;;  %767 = vmatpush.msrb.mxu2 %v762_v57  ;;  %v736_v24 = vld [vmem:[#allocation2 + $0x20] sm:$0xff] }
  0x3c   : > { %662 = vmatpush.msrb.mxu0 %v1357_v16  ;;  %787 = vmatpush.msrb.mxu3 %v745_v59  ;;  %v819_v16 = vld [vmem:[#allocation2 + $0x168] sm:$0xff] }
  0x3d   : > { %687 = vmatpush.msrb.mxu1 %v1409_v26  ;;  %768 = vmatpush.msrb.mxu2 %v761_v58  ;;  %v735_v26 = vld [vmem:[#allocation2 + $0x18] sm:$0xff] }
  0x3e   : > { %663 = vmatpush.msrb.mxu0 %v1372_v19  ;;  %788 = vmatpush.msrb.mxu3 %v744_v61  ;;  %v818_v19 = vld [vmem:[#allocation2 + $0x160] sm:$0xff] }
  0x3f   : > { %688 = vmatpush.msrb.mxu1 %v1425_v29  ;;  %769 = vmatpush.msrb.mxu2 %v760_v60  ;;  %v814_v29 = vld [vmem:[#allocation2 + $0x140] sm:$0xff] }
  0x40   : > { %664 = vmatpush.msrb.mxu0 %v1387_v22  ;;  %789 = vmatpush.msrb.mxu3 %v743_v63  ;;  %v817_v22 = vld [vmem:[#allocation2 + $0x158] sm:$0xff] }
  0x41   : > { %689 = vmatpush.msrb.mxu1 %v1440_v32  ;;  %770 = vmatpush.msrb.mxu2 %v759_v62  ;;  %v732_v32 = vld [vmem:[#allocation2] sm:$0xff] }
  0x42   : > { %665 = vmatpush.msrb.mxu0 %v1402_v25  ;;  %790 = vmatpush.msrb.mxu3 %v742_v1  ;;  %v816_v25 = vld [vmem:[#allocation2 + $0x150] sm:$0xff] }
  0x43   : > { %690 = vmatpush.msrb.mxu1 %v1460_v35  ;;  %771 = vmatpush.msrb.mxu2 %v758_v0 }
  0x44   : > { %666 = vmatpush.msrb.mxu0 %v1417_v28  ;;  %791 = vmatpush.msrb.mxu3 %v741_v3  ;;  %v734_v28 = vld [vmem:[#allocation2 + $0x10] sm:$0xff] }
  0x45   : > { %691 = vmatpush.msrb.mxu1 %v1475_v38  ;;  %772 = vmatpush.msrb.mxu2 %v757_v2 }
  0x46   : > { %667 = vmatpush.msrb.mxu0 %v1433_v31  ;;  %792 = vmatpush.msrb.mxu3 %v740_v12  ;;  %v813_v31 = vld [vmem:[#allocation2 + $0x138] sm:$0xff] }
  0x47   : > { %692 = vmatpush.msrb.mxu1 %v1493_v41  ;;  %773 = vmatpush.msrb.mxu2 %v756_v4  ;;  %v808_v41 = vld [vmem:[#allocation2 + $0x110] sm:$0xff] }
  0x48   : > { %668 = vmatpush.msrb.mxu0 %v1448_v34  ;;  %793 = vmatpush.msrb.mxu3 %v739_v15  ;;  %v811_v34 = vld [vmem:[#allocation2 + $0x128] sm:$0xff] }
  0x49   : > { %693 = vmatpush.msrb.mxu1 %v1519_v44  ;;  %774 = vmatpush.msrb.mxu2 %v755_v5  ;;  %v807_v44 = vld [vmem:[#allocation2 + $0x108] sm:$0xff] }
  0x4a   : > { %669 = vmatpush.msrb.mxu0 %v1468_v37  ;;  %794 = vmatpush.msrb.mxu3 %v738_v18  ;;  %v810_v37 = vld [vmem:[#allocation2 + $0x120] sm:$0xff] }
  0x4b   : > { %694 = vmatpush.msrb.mxu1 %v1527_v46  ;;  %775 = vmatpush.msrb.mxu2 %v754_v7 }
  0x4c   : > { %670 = vmatpush.msrb.mxu0 %v1483_v40  ;;  %795 = vmatpush.msrb.mxu3 %v737_v21  ;;  %v1131_v40 = vld [vmem:[%s1626_s6] ss:$0 sm:$0xff] }
  0x4d   : > { %695 = vmatpush.msrb.mxu1 %v1544_v48  ;;  %776 = vmatpush.msrb.mxu2 %v753_v11 }
  0x4e   : > { %671 = vmatpush.msrb.mxu0 %v1505_v43  ;;  %796 = vmatpush.msrb.mxu3 %v736_v24 }
  0x4f   : > { %696 = vmatpush.msrb.mxu1 %v1557_v49  ;;  %672 = vmatmul.f32.vlgmr.msrb.gmra.mxu0 %v628_v6 }
  0x50   : > { %697 = vmatmul.f32.vlgmr.msrb.gmra.mxu1 %v1530_v47  ;;  %829 = vmatpush.msra.mxu0 %v821_v8  ;;  %v710_v47 = vlaneseq }
  0x51   : > { %777 = vmatpush.msrb.mxu2 %v752_v14  ;;  %797 = vmatpush.msrb.mxu3 %v735_v26 }
  0x52   : > { %830 = vmatpush.msra.mxu0 %v820_v13  ;;  %v711_v49 = vshrl.u32 %v710_v47, 7  ;;  %v1132_v13 = vld [vmem:[%s1628_s8] ss:$0 sm:$0xff] }
  0x53   : > { %778 = vmatpush.msrb.mxu2 %v751_v17  ;;  %798 = vmatpush.msrb.mxu3 %v734_v28 }
  0x54   : > { %831 = vmatpush.msra.mxu0 %v819_v16  ;;  %v716_v50 = vmul.u32 2, %v711_v49  ;;  %v712_v53 = vadd.s32 8, %v711_v49 }
  0x55   : > { %779 = vmatpush.msrb.mxu2 %v750_v20  ;;  %799 = vmatpush.msrb.mxu3 %v733_v30 }
  0x56   : > { %832 = vmatpush.msra.mxu0 %v818_v19  ;;  %v1084_v52 = vadd.s32 4294967295, %v716_v50  ;;  %v717_v58 = vmul.u32 2, %v712_v53  ;;  %v856_v19 = vand.u32 127, %v710_v47 }
  0x57   : > { %675 = vmatmul.f32.gmra.mxu0 %v629_v9  ;;  %780 = vmatpush.msrb.mxu2 %v749_v23 }
  0x58   : > { %700 = vmatmul.f32.gmra.mxu1 %v680_v10  ;;  %833 = vmatpush.msra.mxu0 %v817_v22  ;;  %vm720_vm0 = vcmp.ge.s32.totalorder %v1084_v52, 0  ;;  %vm722_vm1 = vcmp.lt.s32.totalorder %v1084_v52, 8  ;;  %v1085_v62 = vadd.s32 4294967295, %v717_v58  ;;  %vm857_vm7 = vcmp.lt.s32.totalorder %v856_v19, 16 }
  0x59   : > { %800 = vmatpush.msrb.mxu3 %v732_v32  ;;  %vm724_vm2 = vmand %vm720_vm0, %vm722_vm1 }
  0x5a   : > { %834 = vmatpush.msra.mxu0 %v816_v25  ;;  %vm721_vm3 = vcmp.ge.s32.totalorder %v1085_v62, 0  ;;  %vm723_vm4 = vcmp.lt.s32.totalorder %v1085_v62, 8 }
  0x5b   : > { %vm725_vm5 = vmand %vm721_vm3, %vm723_vm4 }
  0x5c   : > { %835 = vmatpush.msra.mxu0 %v815_v27 }
  0x5e   : > { %836 = vmatpush.msra.mxu0 %v814_v29 }
  0x60   : > { %837 = vmatpush.msra.mxu0 %v813_v31 }
  0x62   : > { %838 = vmatpush.msra.mxu0 %v812_v33  ;;  %v1133_v33 = vld [vmem:[%s1629_s9] ss:$0 sm:$0xff] }
  0x64   : > { %839 = vmatpush.msra.mxu0 %v811_v34 }
  0x66   : > { %840 = vmatpush.msra.mxu0 %v810_v37 }
  0x68   : > { %841 = vmatpush.msra.mxu0 %v809_v39 }
  0x6a   : > { %842 = vmatpush.msra.mxu0 %v808_v41 }
  0x6c   : > { %843 = vmatpush.msra.mxu0 %v807_v44 }
  0x6e   : > { %844 = vmatpush.msra.mxu0 %v806_v45 }
  0xac   : > { %v559_v35 = vpop.f32.mrf.mxu0 }
  0xaf   : > { %v579_v36 = vpop.f32.mrf.mxu1 }
  0xb0   : > { %v580_v38 = vadd.f32 %v579_v36, %v559_v35  ;;  %v1134_v35 = vld [vmem:[%s1630_s10] ss:$0 sm:$0xff] }
  0xb4   : > { %v650_v51 = vpop.f32.mrf.mxu3 }
  0xb9   : > { %v618_v42 = vpop.f32.mrf.mxu2 }
  0xba   : > { %v621_v43 = vadd.f32 %v618_v42, %v580_v38 }
  0xbc   : > { %v625_v46 = vadd.f32 %v1131_v40, %v621_v43 }
  0xbd   : > { %v653_v60 = vpop.f32.mrf.mxu3 }
  0xbe   : > { %v626_v48 = vmax.f32 %v625_v46, 0.0 }
  0xc0   : > { %781 = vmatmul.f32.vlgmr.msrb.gmra.mxu2 %v626_v48 }
  0xcc   : > { %v673_v54 = vpop.f32.mrf.mxu0 }
  0xcd   : > { %v698_v55 = vpop.f32.mrf.mxu1  ;;  %v674_v56 = vadd.f32 %v673_v54, %v650_v51 }
  0xcf   : > { %v704_v57 = vadd.f32 %v698_v55, %v674_v56 }
  0xd1   : > { %v706_v59 = vadd.f32 %v1131_v40, %v704_v57 }
  0xd3   : > { %v708_v61 = vmax.f32 %v706_v59, 0.0 }
  0xd4   : > { %v676_v63 = vpop.f32.mrf.mxu0 }
  0xd5   : > { %v701_v0 = vpop.f32.mrf.mxu1  ;;  %v677_v1 = vadd.f32 %v676_v63, %v653_v60  ;;  %1086 = vmatmul.msk.f32.vlgmr.msrb.gmra.mxu3 %vm724_vm2, %v708_v61  ;;  %v730_v4 = vsel %vm724_vm2, %v708_v61, 0.0 }
  0xd6   : > { %v825_v7 = vrot.slane %v730_v4, 1 }
  0xd7   : > { %v705_v2 = vadd.f32 %v701_v0, %v677_v1 }
  0xd9   : > { %v707_v3 = vadd.f32 %v1131_v40, %v705_v2 }
  0xdb   : > { %v709_v5 = vmax.f32 %v707_v3, 0.0 }
  0xdd   : > { %v731_v6 = vsel %vm725_vm5, %v709_v5, 0.0 }
  0xde   : > { %v826_v8 = vrot.slane %v731_v6, 1 }
  0xe0   : > { %v827_v9 = vsel %vm824_vm6, %v825_v7, %v826_v8 }
  0xe1   : > { %845 = vmatmul.f32.vlgmr.msra.gmra.mxu0 %v827_v9 }
 0x143   : > { %v782_v11 = vpop.f32.mrf.mxu2 }
 0x158   : > { %v802_v10 = vpop.f32.mrf.mxu3 }
 0x159   : > { %v803_v12 = vadd.f32 %v802_v10, %v782_v11 }
 0x15e   : > { %v846_v14 = vpop.f32.mrf.mxu0 }
 0x15f   : > { %v849_v15 = vadd.f32 %v846_v14, %v803_v12 }
 0x161   : > { %v853_v16 = vadd.f32 %v1132_v13, %v849_v15 }
 0x163   : > { %v854_v17 = vmax.f32 %v853_v16, 0.0 }
 0x165   : > { %858 = vadd.xlane.f32.xlu0 %v854_v17 }
 0x1d8   : > { %v859_v18 = vpop.xlane.xlu0 %858 }
 0x1d9   : > { %v860_v20 = vmul.f32 0.0625, %v859_v18 }
 0x1db   : > { %v861_v21 = vsub.f32 %v854_v17, %v860_v20 }
 0x1dd   : > { %v862_v22 = vmul.f32 %v861_v21, %v861_v21 }
 0x1df   : > { %v865_v23 = vsel %vm857_vm7, %v862_v22, 0.0 }
 0x1e0   : > { %866 = vadd.xlane.f32.xlu0 %v865_v23 }
 0x253   : > { %v867_v24 = vpop.xlane.xlu0 %866 }
 0x254   : > { %v868_v25 = vmul.f32 0.0625, %v867_v24 }
 0x256   : > { %v869_v26 = vadd.f32 1e-05, %v868_v25 }
 0x258   : > { %1135 = vrsqrt.f32 %v869_v26  ;;  %vm876_vm9 = vweird.f32 %v869_v26 }
 0x25e   : > { %v1136_v27 = vpop.eup %1135 }
 0x25f   : > { %v871_v28 = vmul.f32 %v1136_v27, %v869_v26  ;;  %vm877_vm8 = vweird.f32 %v1136_v27 }
 0x260   : > { %vm878_vm10 = vmor %vm876_vm9, %vm877_vm8 }
 0x261   : > { %v872_v29 = vmul.f32 %v1136_v27, %v871_v28 }
 0x263   : > { %v873_v30 = vmul.f32 0.5, %v872_v29 }
 0x265   : > { %v874_v31 = vsub.f32 1.5, %v873_v30 }
 0x267   : > { %v875_v32 = vmul.f32 %v1136_v27, %v874_v31 }
 0x269   : > { %v879_v34 = vsel %vm878_vm10, %v1136_v27, %v875_v32 }
 0x26a   : > { %v880_v36 = vmul.f32 %v879_v34, %v861_v21 }
 0x26c   : > { %v885_v37 = vmul.f32 %v1133_v33, %v880_v36 }
 0x26e   : > { %v890_v38 = vadd.f32 %v1134_v35, %v885_v37 }
 0x270   : > { %891 = vst [vmem:[%s501_s15] sm:$0xff] %v890_v38 }
 0x271 PF: > { %s22_s19 = sadd.s32 1, %s1193_s19   ;;  %s1632_s17 = smov %s1189_s18 }
 0x272   : > { %p19_p8 = scmp.ge.s32.totalorder %s22_s19, 4   ;;  %s1633_s18 = smov %s1635_s21 }
 0x274   :  { %21 = sbr.rel (!%p19_p8) target bundleno = 2 (0x2), region = 120 }
 0x279   :  { %917 = vsyncpa [#allocation3], 1 }
 0x27a   :  { %919 = vsyncpa [#allocation3 + $0x1], 1 }

</bundles_post_ra>
